<compile_context>
chip_gen: v6e
topology: v6e:2x2x1
jax: 0.10.0
libtpu: 0.0.40
codegen_flags: <defaults>
</compile_context>

<pallas_src>
import jax
import jax.numpy as jnp
from jax import lax
from jax.experimental import pallas as pl
from jax.experimental.pallas import tpu as pltpu

H1 = 256   # hidden-1 width
H2 = 128   # hidden-2 width, zero-padded up from 64 (lane-dense)


def _round_up(x, m):
    return ((x + m - 1) // m) * m


def _value_mlp_kernel(x_ref, w1_ref, b1_ref, w2_ref, b2_ref, w3_ref, b3_ref, o_ref):
    # Cast the f32 states tile to bf16 in-kernel (hidden under the MXU); the
    # wrapper no longer burns an extra HBM pass doing it.
    x = x_ref[...].astype(jnp.bfloat16)

    # Layer 1: (TB, S) bf16 @ (S, 256) bf16 -> f32 acc; bias + ReLU in f32,
    # downcast fused into the epilogue so h1 lives as bf16 (halves spill bytes).
    h1 = jnp.dot(x, w1_ref[...], preferred_element_type=jnp.float32)
    h1 = jnp.maximum(h1 + b1_ref[...], 0.0).astype(jnp.bfloat16)

    # Layer 2: (TB, 256) bf16 @ (256, 128) bf16 -> f32 (padded cols stay exactly 0).
    h2 = jnp.dot(h1, w2_ref[...], preferred_element_type=jnp.float32)
    h2 = jnp.maximum(h2 + b2_ref[...], 0.0).astype(jnp.bfloat16)

    # Layer 3 (64->1): contract the 128-wide (padded) feature axis of h2 against
    # the bf16 w3 row vector -> lane-dense (1, TB) row on the single-pass bf16
    # MXU path (avoids an N=1 result column and masked (TB, 1) partial stores).
    row = lax.dot_general(w3_ref[...], h2,
                          dimension_numbers=(((1,), (1,)), ((), ())),
                          preferred_element_type=jnp.float32)
    o_ref[...] = (row + b3_ref[...]).astype(o_ref.dtype)


def prepare_value_params(params):
    """One-time parameter preprocessing (run at init, NOT per forward call)."""
    w1, b1, w2, b2, w3, b3 = params
    w1b = w1.astype(jnp.bfloat16)                                        # (S, 256)
    w2p = jnp.pad(w2, ((0, 0), (0, H2 - w2.shape[1]))).astype(jnp.bfloat16)  # (256, 128)
    b2p = jnp.pad(b2, ((0, 0), (0, H2 - b2.shape[1])))                   # (1, 128) f32
    w3r = jnp.pad(w3[:, 0][None, :],
                  ((0, 0), (0, H2 - w3.shape[0]))).astype(jnp.bfloat16)  # (1, 128)
    b3r = b3.reshape(1, 1)                                               # (1, 1) f32
    return (w1b, b1, w2p, b2p, w3r, b3r)


def value_model_forward(states, prepared_params, tb=2048):
    """Fused forward of Value_Model. states: [B, state_dim] f32 -> [B, 1] f32."""
    assert tb % 128 == 0, "tb must be a multiple of 128 (lane-dense output tiling)"
    w1b, b1, w2p, b2p, w3r, b3r = prepared_params
    B, S = states.shape

    # Batch tile: at least 128 rows (lane-dense output stores); for larger
    # batches cap the tile so grid_n >= 2 (both v7x TensorCores get work),
    # up to tb rows per step to amortize per-step overhead.
    if B <= 128:
        TB = 128
    else:
        TB = min(tb, _round_up(pl.cdiv(B, 2), 128))
    grid_n = pl.cdiv(B, TB)
    Bp = grid_n * TB    # output lanes (padded); extra lanes are garbage, sliced off

    flops = 2 * Bp * (S * H1 + H1 * H2 + H2)
    bytes_accessed = (B * S * 4                 # states, read once as f32
                      + w1b.size * 2 + w2p.size * 2 + w3r.size * 2
                      + 4 * (b1.size + b2p.size + b3r.size)
                      + 4 * Bp)                 # output row

    out_row = pl.pallas_call(
        _value_mlp_kernel,
        out_shape=jax.ShapeDtypeStruct((1, Bp), jnp.float32),
        grid=(grid_n,),
        in_specs=[
            pl.BlockSpec((TB, S), lambda i: (i, 0)),    # states: tiled over batch
            pl.BlockSpec((S, H1), lambda i: (0, 0)),    # w1: VMEM-resident
            pl.BlockSpec((1, H1), lambda i: (0, 0)),    # b1
            pl.BlockSpec((H1, H2), lambda i: (0, 0)),   # w2 (padded to 128)
            pl.BlockSpec((1, H2), lambda i: (0, 0)),    # b2 (padded to 128)
            pl.BlockSpec((1, H2), lambda i: (0, 0)),    # w3 as bf16 lane row
            pl.BlockSpec((1, 1), lambda i: (0, 0)),     # b3
        ],
        out_specs=pl.BlockSpec((1, TB), lambda i: (0, i)),  # lane-dense output row
        compiler_params=pltpu.CompilerParams(
            dimension_semantics=("parallel",),
            vmem_limit_bytes=32 * 1024 * 1024,
        ),
        cost_estimate=pl.CostEstimate(
            flops=flops, transcendentals=0, bytes_accessed=bytes_accessed),
    )(states, w1b, b1, w2p, b2p, w3r, b3r)

    return out_row[0, :B].reshape(B, 1)


def init_params(key, state_dim):
    """Deterministic synthetic parameters with nn.Linear-like uniform init.

    Weights are stored [in_features, out_features] (transpose of PyTorch's
    nn.Linear [out, in]) so the kernel computes x @ W + b directly.
    """
    ks = jax.random.split(key, 6)

    def linear(kw, kb, fan_in, fan_out):
        bound = 1.0 / jnp.sqrt(jnp.float32(fan_in))
        w = jax.random.uniform(kw, (fan_in, fan_out), jnp.float32, -bound, bound)
        b = jax.random.uniform(kb, (1, fan_out), jnp.float32, -bound, bound)
        return w, b

    w1, b1 = linear(ks[0], ks[1], state_dim, 256)
    w2, b2 = linear(ks[2], ks[3], 256, 64)
    w3, b3 = linear(ks[4], ks[5], 64, 1)
    return (w1, b1, w2, b2, w3, b3)


def _reference(states, params):
    w1, b1, w2, b2, w3, b3 = params
    h = jnp.maximum(states @ w1 + b1, 0.0)
    h = jnp.maximum(h @ w2 + b2, 0.0)
    return h @ w3 + b3


if __name__ == "__main__":
    key = jax.random.PRNGKey(0)
    k_params, k_states, k_states2 = jax.random.split(key, 3)

    batch = 8
    state_dim = 32

    params = init_params(k_params, state_dim)
    prepared = jax.tree_util.tree_map(jax.block_until_ready,
                                      prepare_value_params(params))

    states = jax.random.normal(k_states, (batch, state_dim), jnp.float32)

    out = value_model_forward(states, prepared)
    jax.block_until_ready(out)

    ref = _reference(states, params)
    assert out.shape == (batch, 1)
    # bf16 matmul inputs with f32 accumulation -> loosened tolerance vs f32 reference.
    assert jnp.allclose(out, ref, atol=5e-2, rtol=5e-2), float(
        jnp.max(jnp.abs(out - ref)))

    # Also exercise the multi-tile (grid_n = 2) + ragged-last-block path.
    big_batch = 300
    states_big = jax.random.normal(k_states2, (big_batch, state_dim), jnp.float32)
    out_big = value_model_forward(states_big, prepared)
    jax.block_until_ready(out_big)
    ref_big = _reference(states_big, params)
    assert out_big.shape == (big_batch, 1)
    assert jnp.allclose(out_big, ref_big, atol=5e-2, rtol=5e-2), float(
        jnp.max(jnp.abs(out_big - ref_big)))

    print("KERNEL_OK")
</pallas_src>

<mosaic_0001>
module attributes {stable_mosaic.version = 11 : i64} {
  func.func @_value_mlp_kernel(%arg0: i32, %arg1: memref<128x32xf32, #tpu.memory_space<vmem>>, %arg2: memref<32x256xbf16, #tpu.memory_space<vmem>>, %arg3: memref<1x256xf32, #tpu.memory_space<vmem>>, %arg4: memref<256x128xbf16, #tpu.memory_space<vmem>>, %arg5: memref<1x128xf32, #tpu.memory_space<vmem>>, %arg6: memref<1x128xbf16, #tpu.memory_space<vmem>>, %arg7: memref<1x1xf32, #tpu.memory_space<vmem>>, %arg8: memref<1x128xf32, #tpu.memory_space<vmem>>) attributes {dimension_semantics = [#tpu.dimension_semantics<parallel>], iteration_bounds = array<i64: 1>, scalar_prefetch = 0 : i64, scratch_operands = 0 : i64, tpu.core_type = #tpu.core_type<tc>, window_params = [{transform_indices = @transform_0, window_bounds = array<i64: 128, 32>}, {pipeline_mode = #tpu.pipeline_mode<synchronous>, transform_indices = @transform_1, window_bounds = array<i64: 32, 256>}, {pipeline_mode = #tpu.pipeline_mode<synchronous>, transform_indices = @transform_2, window_bounds = array<i64: 1, 256>}, {pipeline_mode = #tpu.pipeline_mode<synchronous>, transform_indices = @transform_3, window_bounds = array<i64: 256, 128>}, {pipeline_mode = #tpu.pipeline_mode<synchronous>, transform_indices = @transform_4, window_bounds = array<i64: 1, 128>}, {pipeline_mode = #tpu.pipeline_mode<synchronous>, transform_indices = @transform_5, window_bounds = array<i64: 1, 128>}, {pipeline_mode = #tpu.pipeline_mode<synchronous>, transform_indices = @transform_6, window_bounds = array<i64: 1, 1>}, {transform_indices = @transform_7, window_bounds = array<i64: 1, 128>}]} {
    %c0 = arith.constant 0 : index
    %c0_0 = arith.constant 0 : index
    %0 = vector.load %arg1[%c0, %c0_0] : memref<128x32xf32, #tpu.memory_space<vmem>>, vector<128x32xf32>
    %1 = arith.truncf %0 : vector<128x32xf32> to vector<128x32xbf16>
    %c0_1 = arith.constant 0 : index
    %c0_2 = arith.constant 0 : index
    %2 = vector.load %arg2[%c0_1, %c0_2] : memref<32x256xbf16, #tpu.memory_space<vmem>>, vector<32x256xbf16>
    %cst = arith.constant dense<0.000000e+00> : vector<128x256xf32>
    %3 = tpu.matmul %1, %2, %cst {dimension_numbers = #tpu.dot_dimension_numbers<[1], [0], [0], [1], [0, 0, 1, 1], [], []>} : vector<128x32xbf16>, vector<32x256xbf16>, vector<128x256xf32> -> vector<128x256xf32>
    %c0_3 = arith.constant 0 : index
    %c0_4 = arith.constant 0 : index
    %4 = vector.load %arg3[%c0_3, %c0_4] : memref<1x256xf32, #tpu.memory_space<vmem>>, vector<1x256xf32>
    %5 = vector.broadcast %4 : vector<1x256xf32> to vector<128x256xf32>
    %6 = arith.addf %3, %5 : vector<128x256xf32>
    %cst_5 = arith.constant 0.000000e+00 : f32
    %7 = vector.broadcast %cst_5 : f32 to vector<128x256xf32>
    %8 = arith.maximumf %6, %7 : vector<128x256xf32>
    %9 = arith.truncf %8 : vector<128x256xf32> to vector<128x256xbf16>
    %c0_6 = arith.constant 0 : index
    %c0_7 = arith.constant 0 : index
    %10 = vector.load %arg4[%c0_6, %c0_7] : memref<256x128xbf16, #tpu.memory_space<vmem>>, vector<256x128xbf16>
    %cst_8 = arith.constant dense<0.000000e+00> : vector<128x128xf32>
    %11 = tpu.matmul %9, %10, %cst_8 {dimension_numbers = #tpu.dot_dimension_numbers<[1], [0], [0], [1], [0, 0, 1, 1], [], []>} : vector<128x256xbf16>, vector<256x128xbf16>, vector<128x128xf32> -> vector<128x128xf32>
    %c0_9 = arith.constant 0 : index
    %c0_10 = arith.constant 0 : index
    %12 = vector.load %arg5[%c0_9, %c0_10] : memref<1x128xf32, #tpu.memory_space<vmem>>, vector<1x128xf32>
    %13 = vector.broadcast %12 : vector<1x128xf32> to vector<128x128xf32>
    %14 = arith.addf %11, %13 : vector<128x128xf32>
    %cst_11 = arith.constant 0.000000e+00 : f32
    %15 = vector.broadcast %cst_11 : f32 to vector<128x128xf32>
    %16 = arith.maximumf %14, %15 : vector<128x128xf32>
    %17 = arith.truncf %16 : vector<128x128xf32> to vector<128x128xbf16>
    %c0_12 = arith.constant 0 : index
    %c0_13 = arith.constant 0 : index
    %18 = vector.load %arg6[%c0_12, %c0_13] : memref<1x128xbf16, #tpu.memory_space<vmem>>, vector<1x128xbf16>
    %cst_14 = arith.constant dense<0.000000e+00> : vector<1x128xf32>
    %19 = tpu.matmul %18, %17, %cst_14 {dimension_numbers = #tpu.dot_dimension_numbers<[1], [1], [0], [0], [0, 0, 1, 0], [], []>} : vector<1x128xbf16>, vector<128x128xbf16>, vector<1x128xf32> -> vector<1x128xf32>
    %c0_15 = arith.constant 0 : index
    %c0_16 = arith.constant 0 : index
    %20 = vector.load %arg7[%c0_15, %c0_16] : memref<1x1xf32, #tpu.memory_space<vmem>>, vector<1x1xf32>
    %21 = vector.broadcast %20 : vector<1x1xf32> to vector<1x128xf32>
    %22 = arith.addf %19, %21 : vector<1x128xf32>
    %c0_17 = arith.constant 0 : index
    %c0_18 = arith.constant 0 : index
    %23 = vector.load %arg8[%c0_17, %c0_18] : memref<1x128xf32, #tpu.memory_space<vmem>>, vector<1x128xf32>
    tpu.vector_store %arg8[%c0_17, %c0_18], %22 {strides = array<i32>} : memref<1x128xf32, #tpu.memory_space<vmem>>, vector<1x128xf32>,
    return
  }
  func.func @transform_0(%arg0: i32) -> (i32, i32) {
    %c0_i32 = arith.constant 0 : i32
    %c0_i32_0 = arith.constant 0 : i32
    return %arg0, %c0_i32 : i32, i32
  }
  func.func @transform_1(%arg0: i32) -> (i32, i32) {
    %c0_i32 = arith.constant 0 : i32
    %c0_i32_0 = arith.constant 0 : i32
    %c0_i32_1 = arith.constant 0 : i32
    return %c0_i32, %c0_i32_0 : i32, i32
  }
  func.func @transform_2(%arg0: i32) -> (i32, i32) {
    %c0_i32 = arith.constant 0 : i32
    %c0_i32_0 = arith.constant 0 : i32
    %c0_i32_1 = arith.constant 0 : i32
    return %c0_i32, %c0_i32_0 : i32, i32
  }
  func.func @transform_3(%arg0: i32) -> (i32, i32) {
    %c0_i32 = arith.constant 0 : i32
    %c0_i32_0 = arith.constant 0 : i32
    %c0_i32_1 = arith.constant 0 : i32
    return %c0_i32, %c0_i32_0 : i32, i32
  }
  func.func @transform_4(%arg0: i32) -> (i32, i32) {
    %c0_i32 = arith.constant 0 : i32
    %c0_i32_0 = arith.constant 0 : i32
    %c0_i32_1 = arith.constant 0 : i32
    return %c0_i32, %c0_i32_0 : i32, i32
  }
  func.func @transform_5(%arg0: i32) -> (i32, i32) {
    %c0_i32 = arith.constant 0 : i32
    %c0_i32_0 = arith.constant 0 : i32
    %c0_i32_1 = arith.constant 0 : i32
    return %c0_i32, %c0_i32_0 : i32, i32
  }
  func.func @transform_6(%arg0: i32) -> (i32, i32) {
    %c0_i32 = arith.constant 0 : i32
    %c0_i32_0 = arith.constant 0 : i32
    %c0_i32_1 = arith.constant 0 : i32
    return %c0_i32, %c0_i32_0 : i32, i32
  }
  func.func @transform_7(%arg0: i32) -> (i32, i32) {
    %c0_i32 = arith.constant 0 : i32
    %c0_i32_0 = arith.constant 0 : i32
    return %c0_i32, %arg0 : i32, i32
  }
}

</mosaic_0001>

<bundles_post_ra>
// kernel: tpu_custom_call.1
= control target key start
LH: loop header
LB: loop body
LE: loop exit
PB: predicated region body
PF: predicated region fallthrough
CT: control target
= control target key end

     0   :  { %s1052_s0 = inlined_call_operand.hbm [shape: f32[8,32], index: 0, kind: input, shape index: {}]   ;;  %s1053_s1 = inlined_call_operand.hbm [shape: bf16[32,256], index: 1, kind: input, shape index: {}]   ;;  %s1054_s2 = inlined_call_operand.vmem [shape: f32[1,256], index: 2, kind: input, shape index: {}]   ;;  %s1055_s3 = inlined_call_operand.hbm [shape: bf16[256,128], index: 3, kind: input, shape index: {}]   ;;  %s1056_s4 = inlined_call_operand.vmem [shape: f32[1,128], index: 4, kind: input, shape index: {}]   ;;  %s1057_s5 = inlined_call_operand.vmem [shape: bf16[1,128], index: 5, kind: input, shape index: {}]   ;;  %s1058_s6 = inlined_call_operand.<no memory space> [shape: f32[1,1], index: 6, kind: input, shape index: {}]   ;;  %s1059_s7 = inlined_call_operand.hbm [shape: f32[1,128], index: 7, kind: output, shape index: {}]  }
   0x1   :  { %v12_v0 = vstv %s1058_s6 }
   0x2   :  { %13 = vst [vmem:[#allocation2] sm:$0x1] %v12_v0 }
   0x3   :  { %14 = vsyncpa [#allocation4], 0 }
   0x4   :  { %15 = vsyncpa [#allocation7], 0 }
   0x5   :  { %16 = vsyncpa [#allocation5], 0 }
   0x6   :  { %21 = vsyncadd [#allocation4], 1920  ;;  %s883_s26 = smov [#allocation6]   ;;  %s884_s28 = smov [#allocation3]  }
   0x7   :  { %s34_s27 = sshll.u32 %s883_s26, 4  ;;  %s22_s29 = sshll.u32 %s884_s28, 4  ;;  %s35_s27 = int_to_ptr.vmem [resolvable:$true] %s34_s27  ;;  %s23_s29 = int_to_ptr.vmem [resolvable:$true] %s22_s29 }
   0x8   :  { %s805_s30 = scalar_lea.vmem %s35_s27, 512  ;;  %p810_p1 = scmp.lt.s32.totalorder %s35_s27, %s35_s27 }
   0x9   :  { %p806_p0 = scmp.ne.s32.totalorder %s35_s27, %s805_s30  ;;  %p811_p2 = scmp.lt.s32.totalorder %s805_s30, %s805_s30 }
   0xb   :  { %p812_p3 = por %p811_p2, %p810_p1 }
   0xd   :  { %p813_p4 = pnand %p812_p3, %p806_p0 }
   0xf   :  { %816 = shalt.err (!%p813_p4)
}
  0x10   :  { %s885_s8 = smov 128   ;;  %s886_s6 = smov 8  }
  0x11   :  { %40 = dma.hbm_to_vmem [thread:$0]  %s1053_s1, 512, %s35_s27, [#allocation7], %s885_s8, %s885_s8, %s886_s6  }
  0x12   :  { %s825_s11 = scalar_lea.vmem %s23_s29, 128  ;;  %s829_s12 = scalar_lea.vmem %s23_s29, 2048 }
  0x13   :  { %p826_p5 = scmp.ne.s32.totalorder %s23_s29, %s825_s11  ;;  %p830_p6 = scmp.lt.s32.totalorder %s23_s29, %s23_s29 }
  0x14   :  { %p831_p7 = scmp.lt.s32.totalorder %s829_s12, %s825_s11 }
  0x16   :  { %p832_p8 = por %p831_p7, %p830_p6 }
  0x18   :  { %p833_p9 = pnand %p832_p8, %p826_p5 }
  0x1a   :  { %836 = shalt.err (!%p833_p9)
}
  0x1b   :  { %28 = dma.hbm_to_vmem [thread:$0]  %s1052_s0, 128, %s23_s29, [#allocation4], %s885_s8, %s885_s8, %s886_s6  }
  0x1c   :  { %s887_s15 = smov [#allocation8]  }
  0x1d   :  { %s48_s16 = sshll.u32 %s887_s15, 4  ;;  %s49_s16 = int_to_ptr.vmem [resolvable:$true] %s48_s16 }
  0x1e   :  { %s845_s17 = scalar_lea.vmem %s49_s16, 2048  ;;  %p850_p11 = scmp.lt.s32.totalorder %s49_s16, %s49_s16 }
  0x1f   :  { %p846_p10 = scmp.ne.s32.totalorder %s49_s16, %s845_s17  ;;  %p851_p12 = scmp.lt.s32.totalorder %s845_s17, %s845_s17 }
  0x21   :  { %p852_p13 = por %p851_p12, %p850_p11 }
  0x23   :  { %p853_p0 = pnand %p852_p13, %p846_p10 }
  0x25   :  { %856 = shalt.err (!%p853_p0)
}
  0x26   :  { %s888_s1 = smov 64   ;;  %s889_s18 = smov 4  }
  0x27   :  { %54 = dma.hbm_to_vmem [thread:$0]  %s1055_s3, 2048, %s49_s16, [#allocation7], %s888_s1, %s888_s1, %s889_s18  }
  0x28   :  { %877 = dma.done.wait [#allocation4], 2048  }
  0x29   :  { %878 = vsyncadd [#allocation4], 4294965248 }
  0x2a   :  { %879 = dma.done.wait [#allocation7], 2560  }
  0x2b   :  { %880 = vsyncadd [#allocation7], 4294964736  ;;  %v890_v1 = vmov 0   ;;  %v775_v2 = vld [vmem:[#allocation6 + $0x14] ss:$8 sps:$4 sm:$0xff]   ;;  %v71_v6 = vld [vmem:[#allocation3] sm:$0xff]  ;;  %v101_v46 = vlaneseq }
  0x2c   :  { %188 = vmatprep.mubr.bf16.mxu0 %v890_v1  ;;  %774 = vset.pattern.permute.xlu0 %v890_v1  ;;  %v777_v3 = vld [vmem:[#allocation6 + $0x10] ss:$8 sps:$4 sm:$0xff]   ;;  %v778_v4 = vld [vmem:[#allocation6 + $0x4] ss:$8 sps:$4 sm:$0xff]   ;;  %v780_v5 = vld [vmem:[#allocation6] ss:$8 sps:$4 sm:$0xff]  }
  0x2d   :  { %168 = vmatprep.subr.bf16.mxu0 %v775_v2  ;;  %v72_v7 = vld [vmem:[#allocation3 + $0x8] sm:$0xff]  ;;  %vm131_vm0 = vcmask 261120   ;;  %v781_v9 = vld [vmem:[#allocation8 + $0x78] sm:$0xff]   ;;  %v73_v10 = vld [vmem:[#allocation3 + $0x10] sm:$0xff]  ;;  %v963_v47 = vshrl.u32 %v101_v46, 7  ;;  %vm892_vm1 = vmmov 0  }
  0x2e   :  { %169 = vmatpush1.bf16.msra.mxu0 %v777_v3  ;;  %v87_v8 = vpack.c.bf16 %v72_v7, %v71_v6  ;;  %v74_v11 = vld [vmem:[#allocation3 + $0x18] sm:$0xff]  ;;  %670 = vmatprep.subr.bf16.mxu1 %v781_v9  ;;  %v783_v13 = vld [vmem:[#allocation8 + $0x70] sm:$0xff]   ;;  %v785_v15 = vld [vmem:[#allocation8 + $0x68] sm:$0xff]   ;;  %s893_s23 = smov [#allocation9]  }
  0x2f   :  { %170 = vmatprep.subr.bf16.mxu0 %v778_v4  ;;  %v782_v12 = vld [vmem:[#allocation8 + $0x38] sm:$0xff]   ;;  %v784_v14 = vld [vmem:[#allocation8 + $0x30] sm:$0xff]   ;;  %v88_v16 = vpack.c.bf16 %v74_v11, %v73_v10  ;;  %v786_v17 = vld [vmem:[#allocation8 + $0x28] sm:$0xff]   ;;  %v107_v48 = vsub.s32 1, %v963_v47  ;;  %v103_v49 = vsub.s32 0, %v963_v47  ;;  %s631_s24 = sshll.u32 %s893_s23, 4  ;;  %s632_s24 = int_to_ptr.vmem [resolvable:$true] %s631_s24 }
  0x30   :  { %671 = vmatpush3.bf16.msra.mxu1 %v782_v12  ;;  %v787_v18 = vld [vmem:[#allocation8 + $0x60] sm:$0xff]   ;;  %v76_v20 = vld [vmem:[#allocation3 + $0x28] sm:$0xff]  ;;  %v789_v22 = vld [vmem:[#allocation8 + $0x58] sm:$0xff]   ;;  %s857_s25 = scalar_lea.vmem %s632_s24, 16  ;;  %s861_s26 = scalar_lea.vmem %s632_s24, 32 }
  0x31   :  { %672 = vmatprep.subr.bf16.mxu1 %v783_v13  ;;  %v75_v19 = vld [vmem:[#allocation3 + $0x20] sm:$0xff]  ;;  %v790_v24 = vld [vmem:[#allocation8 + $0x18] sm:$0xff]   ;;  %v77_v25 = vld [vmem:[#allocation3 + $0x30] sm:$0xff]  ;;  %p858_p1 = scmp.ne.s32.totalorder %s632_s24, %s857_s25  ;;  %p862_p2 = scmp.lt.s32.totalorder %s632_s24, %s632_s24 }
  0x32   :  { %171 = vmatpush1.bf16.msra.mxu0 %v780_v5  ;;  %v788_v21 = vld [vmem:[#allocation8 + $0x20] sm:$0xff]   ;;  %v89_v23 = vpack.c.bf16 %v76_v20, %v75_v19  ;;  %v78_v26 = vld [vmem:[#allocation3 + $0x38] sm:$0xff]  ;;  %v80_v29 = vld [vmem:[#allocation3 + $0x48] sm:$0xff]  ;;  %p863_p3 = scmp.lt.s32.totalorder %s861_s26, %s857_s25 }
  0x33   :  { %v90_v27 = vpack.c.bf16 %v78_v26, %v77_v25  ;;  %v79_v28 = vld [vmem:[#allocation3 + $0x40] sm:$0xff]  ;;  %v81_v31 = vld [vmem:[#allocation3 + $0x50] sm:$0xff]  ;;  %v82_v32 = vld [vmem:[#allocation3 + $0x58] sm:$0xff] }
  0x34   :  { %673 = vmatpush3.bf16.msra.mxu1 %v784_v14  ;;  %v91_v30 = vpack.c.bf16 %v80_v29, %v79_v28  ;;  %v92_v33 = vpack.c.bf16 %v82_v32, %v81_v31  ;;  %v83_v34 = vld [vmem:[#allocation3 + $0x60] sm:$0xff]  ;;  %v84_v35 = vld [vmem:[#allocation3 + $0x68] sm:$0xff]  ;;  %v85_v37 = vld [vmem:[#allocation3 + $0x70] sm:$0xff]  ;;  %p864_p4 = por %p863_p3, %p862_p2 }
  0x35   :  { %645 = vmatmul.mubr.msk.bf16.vlgmr.msra.gmra.mxu0 %vm131_vm0, %v87_v8  ;;  %674 = vmatprep.subr.bf16.mxu1 %v785_v15  ;;  %v93_v36 = vpack.c.bf16 %v84_v35, %v83_v34  ;;  %v86_v38 = vld [vmem:[#allocation3 + $0x78] sm:$0xff]  ;;  %v791_v40 = vld [vmem:[#allocation8 + $0x50] sm:$0xff]   ;;  %v793_v42 = vld [vmem:[#allocation8 + $0x48] sm:$0xff]  }
  0x36   :  { %198 = vmatprep.mubr.bf16.mxu0 %v890_v1  ;;  %v94_v39 = vpack.c.bf16 %v86_v38, %v85_v37  ;;  %v792_v41 = vld [vmem:[#allocation8 + $0x10] sm:$0xff]   ;;  %v794_v43 = vld [vmem:[#allocation8 + $0x8] sm:$0xff]   ;;  %v795_v44 = vld [vmem:[#allocation8 + $0x40] sm:$0xff]   ;;  %p865_p5 = pnand %p864_p4, %p858_p1 }
  0x37   :  { %v796_v45 = vld [vmem:[#allocation8] sm:$0xff]  }
  0x38   :  { %675 = vmatpush3.bf16.msra.mxu1 %v786_v17  ;;  %v99_v50 = vld [vmem:[%s1054_s2] sm:$0x3] }
  0x39   :  { %676 = vmatprep.subr.bf16.mxu1 %v787_v18  ;;  %v970_v52 = vrot.slane %v99_v50, %v107_v48  ;;  %v974_v53 = vrot.slane %v99_v50, %v103_v49 }
  0x3c   :  { %677 = vmatpush3.bf16.msra.mxu1 %v788_v21 }
  0x3d   :  { %646 = vmatmul.mubr.msk.bf16.gmra.mxu0 %vm131_vm0, %v88_v16  ;;  %678 = vmatprep.subr.bf16.mxu1 %v789_v22 }
  0x3e   :  { %208 = vmatprep.mubr.bf16.mxu0 %v890_v1 }
  0x40   :  { %679 = vmatpush3.bf16.msra.mxu1 %v790_v24 }
  0x41   :  { %680 = vmatprep.subr.bf16.mxu1 %v791_v40 }
  0x44   :  { %681 = vmatpush3.bf16.msra.mxu1 %v792_v41 }
  0x45   :  { %647 = vmatmul.mubr.msk.bf16.gmra.mxu0 %vm131_vm0, %v89_v23  ;;  %682 = vmatprep.subr.bf16.mxu1 %v793_v42 }
  0x46   :  { %218 = vmatprep.mubr.bf16.mxu0 %v890_v1 }
  0x48   :  { %683 = vmatpush3.bf16.msra.mxu1 %v794_v43 }
  0x49   :  { %684 = vmatprep.subr.bf16.mxu1 %v795_v44 }
  0x4c   :  { %685 = vmatpush3.bf16.msra.mxu1 %v796_v45 }
  0x4d   :  { %648 = vmatmul.mubr.msk.bf16.gmra.mxu0 %vm131_vm0, %v90_v27 }
  0x4e   :  { %228 = vmatprep.mubr.bf16.mxu0 %v890_v1 }
  0x55   :  { %649 = vmatmul.mubr.msk.bf16.gmra.mxu0 %vm131_vm0, %v91_v30 }
  0x56   :  { %238 = vmatprep.mubr.bf16.mxu0 %v890_v1 }
  0x5d   :  { %650 = vmatmul.mubr.msk.bf16.gmra.mxu0 %vm131_vm0, %v92_v33 }
  0x5e   :  { %248 = vmatprep.mubr.bf16.mxu0 %v890_v1 }
  0x65   :  { %651 = vmatmul.mubr.msk.bf16.gmra.mxu0 %vm131_vm0, %v93_v36 }
  0x66   :  { %258 = vmatprep.mubr.bf16.mxu0 %v890_v1 }
  0x6d   :  { %652 = vmatmul.mubr.msk.bf16.gmra.mxu0 %vm131_vm0, %v94_v39 }
  0xf5   :  { %v190_v51 = vpop.f32.mrf.mxu0 }
  0xf6   :  { %v191_v58 = vadd.f32 %v190_v51, %v974_v53 }
  0xf7   :  { %v192_v54 = vpop.f32.mrf.mxu0 }
  0xf8   :  { %v193_v56 = vadd.f32 %v192_v54, %v970_v52  ;;  %v269_v1 = vmax.f32 %v191_v58, 0.0 }
  0xf9   :  { %v194_v55 = vpop.f32.mrf.mxu0 }
  0xfa   :  { %v195_v57 = vadd.f32 %v194_v55, %v974_v53  ;;  %v270_v63 = vmax.f32 %v193_v56, 0.0 }
  0xfb   :  { %v196_v59 = vpop.f32.mrf.mxu0 }
  0xfc   :  { %v197_v60 = vadd.f32 %v196_v59, %v970_v52  ;;  %v271_v61 = vmax.f32 %v195_v57, 0.0 }
  0xfd   :  { %v200_v62 = vpop.f32.mrf.mxu0 }
  0xfe   :  { %v272_v0 = vmax.f32 %v197_v60, 0.0  ;;  %v301_v4 = vpack.c.bf16 %v271_v61, %v269_v1  ;;  %v201_v8 = vadd.f32 %v200_v62, %v974_v53 }
  0xff   :  { %v202_v2 = vpop.f32.mrf.mxu0 }
 0x100   :  { %v302_v3 = vpack.c.bf16 %v272_v0, %v270_v63  ;;  %v203_v6 = vadd.f32 %v202_v2, %v970_v52  ;;  %v273_v15 = vmax.f32 %v201_v8, 0.0 }
 0x101   :  { %v204_v5 = vpop.f32.mrf.mxu0 }
 0x102   :  { %v205_v7 = vadd.f32 %v204_v5, %v974_v53  ;;  %484 = vmatprep.mubr.bf16.mxu1 %v302_v3  ;;  %v274_v13 = vmax.f32 %v203_v6, 0.0 }
 0x103   :  { %v206_v9 = vpop.f32.mrf.mxu0  ;;  %485 = vmatmul.mubr.bf16.vlgmr.msra.gmra.mxu1 %v301_v4 }
 0x104   :  { %v207_v10 = vadd.f32 %v206_v9, %v970_v52  ;;  %v275_v11 = vmax.f32 %v205_v7, 0.0 }
 0x105   :  { %v210_v12 = vpop.f32.mrf.mxu0 }
 0x106   :  { %v276_v14 = vmax.f32 %v207_v10, 0.0  ;;  %v303_v18 = vpack.c.bf16 %v275_v11, %v273_v15  ;;  %v211_v22 = vadd.f32 %v210_v12, %v974_v53 }
 0x107   :  { %v212_v16 = vpop.f32.mrf.mxu0 }
 0x108   :  { %v304_v17 = vpack.c.bf16 %v276_v14, %v274_v13  ;;  %v213_v20 = vadd.f32 %v212_v16, %v970_v52  ;;  %v277_v29 = vmax.f32 %v211_v22, 0.0 }
 0x109   :  { %v214_v19 = vpop.f32.mrf.mxu0 }
 0x10a   :  { %v215_v21 = vadd.f32 %v214_v19, %v974_v53  ;;  %492 = vmatprep.mubr.bf16.mxu1 %v304_v17  ;;  %v278_v27 = vmax.f32 %v213_v20, 0.0 }
 0x10b   :  { %v216_v23 = vpop.f32.mrf.mxu0  ;;  %493 = vmatmul.mubr.bf16.gmra.mxu1 %v303_v18 }
 0x10c   :  { %v217_v24 = vadd.f32 %v216_v23, %v970_v52  ;;  %v279_v25 = vmax.f32 %v215_v21, 0.0 }
 0x10d   :  { %v220_v26 = vpop.f32.mrf.mxu0 }
 0x10e   :  { %v280_v28 = vmax.f32 %v217_v24, 0.0  ;;  %v305_v32 = vpack.c.bf16 %v279_v25, %v277_v29  ;;  %v221_v36 = vadd.f32 %v220_v26, %v974_v53 }
 0x10f   :  { %v222_v30 = vpop.f32.mrf.mxu0 }
 0x110   :  { %v306_v31 = vpack.c.bf16 %v280_v28, %v278_v27  ;;  %v223_v34 = vadd.f32 %v222_v30, %v970_v52  ;;  %v281_v43 = vmax.f32 %v221_v36, 0.0 }
 0x111   :  { %v224_v33 = vpop.f32.mrf.mxu0 }
 0x112   :  { %v225_v35 = vadd.f32 %v224_v33, %v974_v53  ;;  %500 = vmatprep.mubr.bf16.mxu1 %v306_v31  ;;  %v282_v41 = vmax.f32 %v223_v34, 0.0 }
 0x113   :  { %v226_v37 = vpop.f32.mrf.mxu0  ;;  %501 = vmatmul.mubr.bf16.gmra.mxu1 %v305_v32 }
 0x114   :  { %v227_v38 = vadd.f32 %v226_v37, %v970_v52  ;;  %v283_v39 = vmax.f32 %v225_v35, 0.0 }
 0x115   :  { %v230_v40 = vpop.f32.mrf.mxu0 }
 0x116   :  { %v284_v42 = vmax.f32 %v227_v38, 0.0  ;;  %v307_v46 = vpack.c.bf16 %v283_v39, %v281_v43  ;;  %v231_v54 = vadd.f32 %v230_v40, %v974_v53 }
 0x117   :  { %v232_v44 = vpop.f32.mrf.mxu0 }
 0x118   :  { %v308_v45 = vpack.c.bf16 %v284_v42, %v282_v41  ;;  %v233_v50 = vadd.f32 %v232_v44, %v970_v52  ;;  %v285_v61 = vmax.f32 %v231_v54, 0.0  ;;  %v891_v41 = vmov 0.0  }
 0x119   :  { %v234_v48 = vpop.f32.mrf.mxu0  ;;  %743 = vmatprep.subr.bf16.mxu0 %v891_v41  ;;  %759 = vmatprep.mubr.msk.bf16.mxu0 %vm892_vm1, %v891_v41 }
 0x11a   :  { %v235_v51 = vadd.f32 %v234_v48, %v974_v53  ;;  %508 = vmatprep.mubr.bf16.mxu1 %v308_v45  ;;  %v286_v59 = vmax.f32 %v233_v50, 0.0 }
 0x11b   :  { %v236_v55 = vpop.f32.mrf.mxu0  ;;  %509 = vmatmul.mubr.bf16.gmra.mxu1 %v307_v46  ;;  %v574_v46 = vld [vmem:[#allocation2] sm:$0x1] }
 0x11c   :  { %v237_v56 = vadd.f32 %v236_v55, %v970_v52  ;;  %v287_v57 = vmax.f32 %v235_v51, 0.0  ;;  %577 = vperm.xlu0 %774, %v574_v46  }
 0x11d   :  { %v240_v58 = vpop.f32.mrf.mxu0 }
 0x11e   :  { %v288_v60 = vmax.f32 %v237_v56, 0.0  ;;  %v309_v0 = vpack.c.bf16 %v287_v57, %v285_v61  ;;  %v241_v4 = vadd.f32 %v240_v58, %v974_v53 }
 0x11f   :  { %v242_v62 = vpop.f32.mrf.mxu0 }
 0x120   :  { %v310_v63 = vpack.c.bf16 %v288_v60, %v286_v59  ;;  %v243_v2 = vadd.f32 %v242_v62, %v970_v52  ;;  %v289_v11 = vmax.f32 %v241_v4, 0.0 }
 0x121   :  { %v244_v1 = vpop.f32.mrf.mxu0 }
 0x122   :  { %v245_v3 = vadd.f32 %v244_v1, %v974_v53  ;;  %516 = vmatprep.mubr.bf16.mxu1 %v310_v63  ;;  %v290_v9 = vmax.f32 %v243_v2, 0.0 }
 0x123   :  { %v246_v5 = vpop.f32.mrf.mxu0  ;;  %517 = vmatmul.mubr.bf16.gmra.mxu1 %v309_v0 }
 0x124   :  { %v247_v6 = vadd.f32 %v246_v5, %v970_v52  ;;  %v291_v7 = vmax.f32 %v245_v3, 0.0 }
 0x125   :  { %v250_v8 = vpop.f32.mrf.mxu0 }
 0x126   :  { %v292_v10 = vmax.f32 %v247_v6, 0.0  ;;  %v311_v14 = vpack.c.bf16 %v291_v7, %v289_v11  ;;  %v251_v18 = vadd.f32 %v250_v8, %v974_v53 }
 0x127   :  { %v252_v12 = vpop.f32.mrf.mxu0 }
 0x128   :  { %v312_v13 = vpack.c.bf16 %v292_v10, %v290_v9  ;;  %v253_v16 = vadd.f32 %v252_v12, %v970_v52  ;;  %v293_v25 = vmax.f32 %v251_v18, 0.0 }
 0x129   :  { %v254_v15 = vpop.f32.mrf.mxu0 }
 0x12a   :  { %v255_v17 = vadd.f32 %v254_v15, %v974_v53  ;;  %524 = vmatprep.mubr.bf16.mxu1 %v312_v13  ;;  %v294_v23 = vmax.f32 %v253_v16, 0.0 }
 0x12b   :  { %v256_v19 = vpop.f32.mrf.mxu0  ;;  %525 = vmatmul.mubr.bf16.gmra.mxu1 %v311_v14 }
 0x12c   :  { %v257_v20 = vadd.f32 %v256_v19, %v970_v52  ;;  %v295_v21 = vmax.f32 %v255_v17, 0.0 }
 0x12d   :  { %v260_v22 = vpop.f32.mrf.mxu0 }
 0x12e   :  { %v296_v24 = vmax.f32 %v257_v20, 0.0  ;;  %v313_v28 = vpack.c.bf16 %v295_v21, %v293_v25  ;;  %v261_v32 = vadd.f32 %v260_v22, %v974_v53 }
 0x12f   :  { %v262_v26 = vpop.f32.mrf.mxu0 }
 0x130   :  { %v314_v27 = vpack.c.bf16 %v296_v24, %v294_v23  ;;  %v263_v30 = vadd.f32 %v262_v26, %v970_v52  ;;  %v297_v38 = vmax.f32 %v261_v32, 0.0 }
 0x131   :  { %v264_v29 = vpop.f32.mrf.mxu0 }
 0x132   :  { %v265_v31 = vadd.f32 %v264_v29, %v974_v53  ;;  %532 = vmatprep.mubr.bf16.mxu1 %v314_v27  ;;  %v298_v36 = vmax.f32 %v263_v30, 0.0 }
 0x133   :  { %v266_v33 = vpop.f32.mrf.mxu0  ;;  %533 = vmatmul.mubr.bf16.gmra.mxu1 %v313_v28 }
 0x134   :  { %v267_v34 = vadd.f32 %v266_v33, %v970_v52  ;;  %v299_v35 = vmax.f32 %v265_v31, 0.0  ;;  %v1013_v52 = vld [vmem:[%s1056_s4] ss:$0 sm:$0xff] }
 0x136   :  { %v300_v37 = vmax.f32 %v267_v34, 0.0  ;;  %v315_v40 = vpack.c.bf16 %v299_v35, %v297_v38 }
 0x138   :  { %v316_v39 = vpack.c.bf16 %v300_v37, %v298_v36 }
 0x13a   :  { %540 = vmatprep.mubr.bf16.mxu1 %v316_v39 }
 0x13b   :  { %541 = vmatmul.mubr.bf16.gmra.mxu1 %v315_v40 }
 0x1c3   :  { %v686_v42 = vpop.f32.mrf.mxu1 }
 0x1c5   :  { %v687_v53 = vpop.f32.mrf.mxu1 }
 0x1c6   :  { %v688_v43 = vadd.f32 %v687_v53, %v686_v42 }
 0x1c7   :  { %v689_v44 = vpop.f32.mrf.mxu1 }
 0x1c8   :  { %v487_v48 = vadd.f32 %v688_v43, %v1013_v52 }
 0x1c9   :  { %v690_v45 = vpop.f32.mrf.mxu1 }
 0x1ca   :  { %v691_v50 = vadd.f32 %v690_v45, %v689_v44  ;;  %v549_v56 = vmax.f32 %v487_v48, 0.0 }
 0x1cb   :  { %v692_v51 = vpop.f32.mrf.mxu1 }
 0x1cc   :  { %v490_v54 = vadd.f32 %v691_v50, %v1013_v52 }
 0x1cd   :  { %v693_v55 = vpop.f32.mrf.mxu1 }
 0x1ce   :  { %v550_v57 = vmax.f32 %v490_v54, 0.0  ;;  %v694_v58 = vadd.f32 %v693_v55, %v692_v51 }
 0x1cf   :  { %v695_v59 = vpop.f32.mrf.mxu1 }
 0x1d0   :  { %v1017_v60 = vpack.c.bf16 %v550_v57, %v549_v56  ;;  %v495_v62 = vadd.f32 %v694_v58, %v1013_v52 }
 0x1d1   :  { %v696_v61 = vpop.f32.mrf.mxu1 }
 0x1d2   :  { %v697_v63 = vadd.f32 %v696_v61, %v695_v59  ;;  %v551_v3 = vmax.f32 %v495_v62, 0.0 }
 0x1d3   :  { %v698_v0 = vpop.f32.mrf.mxu1 }
 0x1d4   :  { %v498_v1 = vadd.f32 %v697_v63, %v1013_v52 }
 0x1d5   :  { %v699_v2 = vpop.f32.mrf.mxu1 }
 0x1d6   :  { %v552_v4 = vmax.f32 %v498_v1, 0.0  ;;  %v700_v5 = vadd.f32 %v699_v2, %v698_v0 }
 0x1d7   :  { %v701_v6 = vpop.f32.mrf.mxu1 }
 0x1d8   :  { %v1021_v7 = vpack.c.bf16 %v552_v4, %v551_v3  ;;  %v503_v9 = vadd.f32 %v700_v5, %v1013_v52 }
 0x1d9   :  { %v702_v8 = vpop.f32.mrf.mxu1 }
 0x1da   :  { %v703_v10 = vadd.f32 %v702_v8, %v701_v6  ;;  %v553_v14 = vmax.f32 %v503_v9, 0.0 }
 0x1db   :  { %v704_v11 = vpop.f32.mrf.mxu1 }
 0x1dc   :  { %v506_v12 = vadd.f32 %v703_v10, %v1013_v52 }
 0x1dd   :  { %v705_v13 = vpop.f32.mrf.mxu1 }
 0x1de   :  { %v554_v15 = vmax.f32 %v506_v12, 0.0  ;;  %v706_v16 = vadd.f32 %v705_v13, %v704_v11  ;;  %v578_v12 = vpop.permute.xlu0 %577 }
 0x1df   :  { %v707_v17 = vpop.f32.mrf.mxu1  ;;  %v583_v13 = vrot.slane %v578_v12, %v103_v49 }
 0x1e0   :  { %v567_v18 = vpack.c.bf16 %v554_v15, %v553_v14  ;;  %v511_v20 = vadd.f32 %v706_v16, %v1013_v52 }
 0x1e1   :  { %v708_v19 = vpop.f32.mrf.mxu1 }
 0x1e2   :  { %v709_v21 = vadd.f32 %v708_v19, %v707_v17  ;;  %v555_v25 = vmax.f32 %v511_v20, 0.0 }
 0x1e3   :  { %v710_v22 = vpop.f32.mrf.mxu1 }
 0x1e4   :  { %v514_v23 = vadd.f32 %v709_v21, %v1013_v52 }
 0x1e5   :  { %v711_v24 = vpop.f32.mrf.mxu1 }
 0x1e6   :  { %v556_v26 = vmax.f32 %v514_v23, 0.0  ;;  %v712_v3 = vadd.f32 %v711_v24, %v710_v22 }
 0x1e7   :  { %v713_v27 = vpop.f32.mrf.mxu1 }
 0x1e8   :  { %v568_v28 = vpack.c.bf16 %v556_v26, %v555_v25  ;;  %v519_v8 = vadd.f32 %v712_v3, %v1013_v52 }
 0x1e9   :  { %v714_v29 = vpop.f32.mrf.mxu1 }
 0x1ea   :  { %v715_v1 = vadd.f32 %v714_v29, %v713_v27  ;;  %v557_v10 = vmax.f32 %v519_v8, 0.0 }
 0x1eb   :  { %v716_v30 = vpop.f32.mrf.mxu1 }
 0x1ec   :  { %v522_v5 = vadd.f32 %v715_v1, %v1013_v52 }
 0x1ed   :  { %v717_v31 = vpop.f32.mrf.mxu1 }
 0x1ee   :  { %v718_v59 = vadd.f32 %v717_v31, %v716_v30  ;;  %v558_v9 = vmax.f32 %v522_v5, 0.0 }
 0x1ef   :  { %v719_v32 = vpop.f32.mrf.mxu1 }
 0x1f0   :  { %v527_v0 = vadd.f32 %v718_v59, %v1013_v52  ;;  %v569_v11 = vpack.c.bf16 %v558_v9, %v557_v10 }
 0x1f1   :  { %v720_v33 = vpop.f32.mrf.mxu1 }
 0x1f2   :  { %v721_v57 = vadd.f32 %v720_v33, %v719_v32  ;;  %v559_v4 = vmax.f32 %v527_v0, 0.0 }
 0x1f3   :  { %v722_v34 = vpop.f32.mrf.mxu1 }
 0x1f4   :  { %v530_v62 = vadd.f32 %v721_v57, %v1013_v52 }
 0x1f5   :  { %v723_v35 = vpop.f32.mrf.mxu1 }
 0x1f6   :  { %v724_v48 = vadd.f32 %v723_v35, %v722_v34  ;;  %v560_v2 = vmax.f32 %v530_v62, 0.0 }
 0x1f7   :  { %v725_v36 = vpop.f32.mrf.mxu1 }
 0x1f8   :  { %v535_v56 = vadd.f32 %v724_v48, %v1013_v52  ;;  %v570_v6 = vpack.c.bf16 %v560_v2, %v559_v4 }
 0x1f9   :  { %v726_v37 = vpop.f32.mrf.mxu1 }
 0x1fa   :  { %v727_v45 = vadd.f32 %v726_v37, %v725_v36  ;;  %v561_v61 = vmax.f32 %v535_v56, 0.0 }
 0x1fb   :  { %v728_v38 = vpop.f32.mrf.mxu1 }
 0x1fc   :  { %v538_v54 = vadd.f32 %v727_v45, %v1013_v52 }
 0x1fd   :  { %v729_v39 = vpop.f32.mrf.mxu1 }
 0x1fe   :  { %v730_v40 = vadd.f32 %v729_v39, %v728_v38  ;;  %v562_v58 = vmax.f32 %v538_v54, 0.0 }
 0x1ff   :  { %v731_v42 = vpop.f32.mrf.mxu1 }
 0x200   :  { %v543_v43 = vadd.f32 %v730_v40, %v1013_v52  ;;  %v571_v63 = vpack.c.bf16 %v562_v58, %v561_v61 }
 0x201   :  { %v732_v53 = vpop.f32.mrf.mxu1 }
 0x202   :  { %v733_v44 = vadd.f32 %v732_v53, %v731_v42  ;;  %v563_v50 = vmax.f32 %v543_v43, 0.0 }
 0x204   :  { %v546_v46 = vadd.f32 %v733_v44, %v1013_v52  ;;  %v573_v52 = vld [vmem:[%s1057_s5] sm:$0x1] }
 0x206   :  { %v564_v51 = vmax.f32 %v546_v46, 0.0 }
 0x208   :  { %v572_v55 = vpack.c.bf16 %v564_v51, %v563_v50 }
 0x20a   :  { %744 = vmatpush3.bf16.xpose.msra.mxu0 %v572_v55 }
 0x20b   :  { %745 = vmatprep.subr.bf16.mxu0 %v891_v41 }
 0x212   :  { %746 = vmatpush3.bf16.xpose.msra.mxu0 %v571_v63 }
 0x213   :  { %747 = vmatprep.subr.bf16.mxu0 %v891_v41 }
 0x21a   :  { %748 = vmatpush3.bf16.xpose.msra.mxu0 %v570_v6 }
 0x21b   :  { %749 = vmatprep.subr.bf16.mxu0 %v891_v41 }
 0x222   :  { %750 = vmatpush3.bf16.xpose.msra.mxu0 %v569_v11 }
 0x223   :  { %751 = vmatprep.subr.bf16.mxu0 %v891_v41 }
 0x22a   :  { %752 = vmatpush3.bf16.xpose.msra.mxu0 %v568_v28 }
 0x22b   :  { %753 = vmatprep.subr.bf16.mxu0 %v891_v41 }
 0x232   :  { %754 = vmatpush3.bf16.xpose.msra.mxu0 %v567_v18 }
 0x233   :  { %755 = vmatprep.subr.bf16.mxu0 %v891_v41 }
 0x23a   :  { %756 = vmatpush3.bf16.xpose.msra.mxu0 %v1021_v7 }
 0x23b   :  { %757 = vmatprep.subr.bf16.mxu0 %v891_v41 }
 0x242   :  { %758 = vmatpush3.bf16.xpose.msra.mxu0 %v1017_v60 }
 0x249   :  { %760 = vmatmul.mubr.bf16.vlgmr.msra.gmra.mxu0 %v573_v52 }
 0x309   :  { %v618_v14 = vpop.f32.mrf.mxu0 }
 0x30a   :  { %v619_v15 = vadd.f32 %v618_v14, %v583_v13 }
 0x30b   :  { %v761_v16 = vpop.f32.mrf.mxu0 }
 0x30c   :  { %624 = vst [vmem:[#allocation9] sm:$0x1] %v619_v15 }
 0x30d   :  { %v621_v7 = vpop.f32.mrf.mxu0 }
 0x30e   :  { %868 = shalt.err (!%p865_p5)
}
 0x30f   :  { %634 = dma.vmem_to_hbm [thread:$0]  %s632_s24, 16, %s1059_s7, [#allocation5]   ;;  %v762_v47 = vpop.f32.mrf.mxu0 }
 0x310   :  { %881 = dma.done.wait [#allocation5], 16  }
 0x311   :  { %882 = vsyncadd [#allocation5], 4294967280 }
 0x312   :  { %638 = vsyncpa [#allocation4], 1 }
 0x313   :  { %639 = vsyncpa [#allocation7], 1 }
 0x314   :  { %640 = vsyncpa [#allocation5], 1 }

</bundles_post_ra>
